<compile_context>
chip_gen: v6e
topology: v6e:2x2x1
jax: 0.10.0
libtpu: 0.0.40
codegen_flags: <defaults>
</compile_context>

<pallas_src>
import functools

import jax
import jax.numpy as jnp
from jax.experimental import pallas as pl
from jax.experimental.pallas import tpu as pltpu


def _ffn_kernel(x_ref, w1_ref, b1_ref, w2_ref, b2_ref, o_ref, *, tc, n_chunks):
    # x_ref: (tm, dim); w1_ref: (dim, hidden); b1_ref: (1, hidden)
    # w2_ref: (hidden, dim); b2_ref: (1, dim); o_ref: (tm, dim)
    x = x_ref[...]
    acc = jnp.zeros(o_ref.shape, jnp.float32)
    inv_sqrt2 = jnp.float32(0.7071067811865476)

    # Unrolled hidden-axis chunk loop: lets the scheduler overlap the erf
    # polynomial (VPU) of one chunk with the matmuls (MXU) of its neighbours,
    # and keeps the f32 intermediate at (tm, tc) instead of (tm, hidden).
    for c in range(n_chunks):
        lo = c * tc
        hi = lo + tc
        # First matmul chunk: native-dtype operands on the MXU, f32 accumulate.
        h = jnp.dot(x, w1_ref[:, lo:hi], preferred_element_type=jnp.float32)
        h = h + b1_ref[:, lo:hi].astype(jnp.float32)
        # Exact GELU (torch.nn.GELU default, approximate='none'), in f32.
        h = 0.5 * h * (1.0 + jax.lax.erf(h * inv_sqrt2))
        # Dropout(p=0.0) is the identity - nothing to do.
        # Second matmul chunk: cast back to the weight dtype so bf16 weights
        # keep the fast MXU path (no-op when everything is f32).
        acc = acc + jnp.dot(h.astype(w2_ref.dtype), w2_ref[lo:hi, :],
                            preferred_element_type=jnp.float32)

    o_ref[...] = (acc + b2_ref[...].astype(jnp.float32)).astype(o_ref.dtype)


def _sublane_multiple(dtype):
    # Minimum second-minor tile: 8 rows for 4-byte, 16 for 2-byte, 32 for 1-byte.
    return {4: 8, 2: 16, 1: 32}.get(jnp.dtype(dtype).itemsize, 8)


def _pick_tm(M, sub, tm_max=256, overhead_rows=32):
    """Row-tile choice balancing padding waste, per-step overhead (~0.35us
    ~ `overhead_rows` rows of FFN work) and a preference for >= 2 grid steps
    (v7x has two TensorCores)."""
    best_key, best_tm = None, sub
    tm = sub
    while tm <= tm_max:
        steps = -(-M // tm)  # cdiv
        cost = steps * tm + overhead_rows * steps
        if steps == 1:
            cost += overhead_rows  # treat 1-step grids as if they paid an extra step
        key = (cost, 0 if steps >= 2 else 1, -tm)
        if best_key is None or key < best_key:
            best_key, best_tm = key, tm
        tm *= 2
    return best_tm


def _pick_chunk(hidden, target):
    """Largest multiple-of-128 divisor of `hidden` that is <= target; falls
    back to `hidden` (no chunking) when none exists."""
    if hidden <= target:
        return hidden
    for tc in range(target, 0, -128):
        if tc > 0 and hidden % tc == 0:
            return tc
    return hidden


@functools.partial(jax.jit, static_argnames=("tm_max", "tc_target"))
def feed_forward(x, w1, b1, w2, b2, *, tm_max=256, tc_target=512):
    """x: [B, N, dim] -> [B, N, dim].  w1: [dim, hidden], w2: [hidden, dim]."""
    B, N, dim = x.shape
    hidden = w1.shape[1]
    M = B * N

    sub = _sublane_multiple(x.dtype)
    tm = _pick_tm(M, sub, tm_max=max(tm_max, sub))
    steps = -(-M // tm)
    M_pad = steps * tm

    tc = _pick_chunk(hidden, tc_target)
    n_chunks = hidden // tc

    x2d = x.reshape(M, dim)
    if M_pad != M:
        x2d = jnp.pad(x2d, ((0, M_pad - M), (0, 0)))

    b1_2d = b1.reshape(1, hidden)
    b2_2d = b2.reshape(1, dim)

    # VMEM footprint (weights single-buffered via Buffered(1); x/out tiles
    # double-buffered by the pipeline; per-chunk f32 intermediate + cast copy
    # + f32 accumulator).  25% margin + 2 MiB, capped at 56 MiB for v7x.
    w_bytes = ((dim * hidden + hidden) * w1.dtype.itemsize
               + (hidden * dim + dim) * w2.dtype.itemsize)
    xo_bytes = 2 * tm * dim * (x.dtype.itemsize + x.dtype.itemsize)
    scratch_bytes = tm * tc * (4 + w2.dtype.itemsize) + tm * dim * 4
    footprint = w_bytes + xo_bytes + scratch_bytes
    vmem_limit = int(min(56 << 20, max(32 << 20, footprint * 5 // 4 + (2 << 20))))

    cost = pl.CostEstimate(
        flops=4 * M_pad * dim * hidden,           # two matmuls
        transcendentals=M_pad * hidden,           # erf per hidden activation
        bytes_accessed=(x2d.size * x2d.dtype.itemsize
                        + w1.size * w1.dtype.itemsize
                        + b1.size * b1.dtype.itemsize
                        + w2.size * w2.dtype.itemsize
                        + b2.size * b2.dtype.itemsize
                        + M_pad * dim * x.dtype.itemsize),
    )

    resident = pl.Buffered(1)  # constant index_map -> single buffer is enough

    out2d = pl.pallas_call(
        functools.partial(_ffn_kernel, tc=tc, n_chunks=n_chunks),
        out_shape=jax.ShapeDtypeStruct((M_pad, dim), x.dtype),
        grid_spec=pltpu.PrefetchScalarGridSpec(
            num_scalar_prefetch=0,
            grid=(steps,),
            in_specs=[
                pl.BlockSpec((tm, dim), lambda i: (i, 0)),                     # x row tile
                pl.BlockSpec((dim, hidden), lambda i: (0, 0),
                             pipeline_mode=resident),                          # W1 (resident)
                pl.BlockSpec((1, hidden), lambda i: (0, 0),
                             pipeline_mode=resident),                          # b1
                pl.BlockSpec((hidden, dim), lambda i: (0, 0),
                             pipeline_mode=resident),                          # W2 (resident)
                pl.BlockSpec((1, dim), lambda i: (0, 0),
                             pipeline_mode=resident),                          # b2
            ],
            out_specs=pl.BlockSpec((tm, dim), lambda i: (i, 0)),
        ),
        compiler_params=pltpu.CompilerParams(
            dimension_semantics=("parallel",),
            vmem_limit_bytes=vmem_limit,
        ),
        cost_estimate=cost,
    )(x2d, w1, b1_2d, w2, b2_2d)

    return out2d[:M].reshape(B, N, dim)


def _reference(x, w1, b1, w2, b2):
    h = x @ w1 + b1
    h = jax.nn.gelu(h, approximate=False)
    return h @ w2 + b2


if __name__ == "__main__":
    # Small shapes consistent with the module (dim/hidden multiples of 128 so
    # loads/stores are lane-dense).  B*N = 24 exercises the pad-and-slice path
    # and tc_target=128 exercises the hidden-chunk loop (2 chunks).
    B, N, dim, hidden = 2, 12, 128, 256

    key = jax.random.PRNGKey(0)
    kx, kw1, kb1, kw2, kb2 = jax.random.split(key, 5)

    x = jax.random.normal(kx, (B, N, dim), dtype=jnp.float32)
    # Deterministic parameter init (synthetic, roughly Kaiming-uniform scale).
    w1 = jax.random.uniform(kw1, (dim, hidden), jnp.float32,
                            -1.0 / dim ** 0.5, 1.0 / dim ** 0.5)
    b1 = jax.random.uniform(kb1, (hidden,), jnp.float32,
                            -1.0 / dim ** 0.5, 1.0 / dim ** 0.5)
    w2 = jax.random.uniform(kw2, (hidden, dim), jnp.float32,
                            -1.0 / hidden ** 0.5, 1.0 / hidden ** 0.5)
    b2 = jax.random.uniform(kb2, (dim,), jnp.float32,
                            -1.0 / hidden ** 0.5, 1.0 / hidden ** 0.5)

    y = feed_forward(x, w1, b1, w2, b2, tm_max=256, tc_target=128)
    jax.block_until_ready(y)

    y_ref = _reference(x, w1, b1, w2, b2)
    assert y.shape == (B, N, dim)
    assert jnp.allclose(y, y_ref, atol=2e-4, rtol=2e-4), "mismatch vs reference"

    print("KERNEL_OK")
</pallas_src>

<mosaic_0001>
module attributes {stable_mosaic.version = 11 : i64} {
  func.func @_ffn_kernel(%arg0: i32, %arg1: memref<16x128xf32, #tpu.memory_space<vmem>>, %arg2: memref<128x256xf32, #tpu.memory_space<vmem>>, %arg3: memref<1x256xf32, #tpu.memory_space<vmem>>, %arg4: memref<256x128xf32, #tpu.memory_space<vmem>>, %arg5: memref<1x128xf32, #tpu.memory_space<vmem>>, %arg6: memref<16x128xf32, #tpu.memory_space<vmem>>) attributes {dimension_semantics = [#tpu.dimension_semantics<parallel>], iteration_bounds = array<i64: 2>, scalar_prefetch = 0 : i64, scratch_operands = 0 : i64, tpu.core_type = #tpu.core_type<tc>, window_params = [{transform_indices = @transform_0, window_bounds = array<i64: 16, 128>}, {pipeline_mode = #tpu.pipeline_mode<synchronous>, transform_indices = @transform_1, window_bounds = array<i64: 128, 256>}, {pipeline_mode = #tpu.pipeline_mode<synchronous>, transform_indices = @transform_2, window_bounds = array<i64: 1, 256>}, {pipeline_mode = #tpu.pipeline_mode<synchronous>, transform_indices = @transform_3, window_bounds = array<i64: 256, 128>}, {pipeline_mode = #tpu.pipeline_mode<synchronous>, transform_indices = @transform_4, window_bounds = array<i64: 1, 128>}, {transform_indices = @transform_5, window_bounds = array<i64: 16, 128>}]} {
    %c0 = arith.constant 0 : index
    %c0_0 = arith.constant 0 : index
    %0 = vector.load %arg1[%c0, %c0_0] : memref<16x128xf32, #tpu.memory_space<vmem>>, vector<16x128xf32>
    %cst = arith.constant 0.000000e+00 : f32
    %1 = vector.broadcast %cst : f32 to vector<16x128xf32>
    %c0_1 = arith.constant 0 : index
    %c0_2 = arith.constant 0 : index
    %2 = vector.load %arg2[%c0_1, %c0_2] : memref<128x256xf32, #tpu.memory_space<vmem>>, vector<128x128xf32>
    %cst_3 = arith.constant dense<0.000000e+00> : vector<16x128xf32>
    %3 = tpu.matmul %0, %2, %cst_3 {dimension_numbers = #tpu.dot_dimension_numbers<[1], [0], [0], [1], [0, 0, 1, 1], [], []>} : vector<16x128xf32>, vector<128x128xf32>, vector<16x128xf32> -> vector<16x128xf32>
    %c0_4 = arith.constant 0 : index
    %c0_5 = arith.constant 0 : index
    %4 = vector.load %arg3[%c0_4, %c0_5] : memref<1x256xf32, #tpu.memory_space<vmem>>, vector<1x128xf32>
    %5 = vector.broadcast %4 : vector<1x128xf32> to vector<16x128xf32>
    %6 = arith.addf %3, %5 : vector<16x128xf32>
    %cst_6 = arith.constant 5.000000e-01 : f32
    %7 = vector.broadcast %cst_6 : f32 to vector<16x128xf32>
    %8 = arith.mulf %7, %6 : vector<16x128xf32>
    %cst_7 = arith.constant 0.707106769 : f32
    %9 = vector.broadcast %cst_7 : f32 to vector<16x128xf32>
    %10 = arith.mulf %6, %9 : vector<16x128xf32>
    %11 = math.erf %10 : vector<16x128xf32>
    %cst_8 = arith.constant 1.000000e+00 : f32
    %12 = vector.broadcast %cst_8 : f32 to vector<16x128xf32>
    %13 = arith.addf %12, %11 : vector<16x128xf32>
    %14 = arith.mulf %8, %13 : vector<16x128xf32>
    %c0_9 = arith.constant 0 : index
    %c0_10 = arith.constant 0 : index
    %15 = vector.load %arg4[%c0_9, %c0_10] : memref<256x128xf32, #tpu.memory_space<vmem>>, vector<128x128xf32>
    %cst_11 = arith.constant dense<0.000000e+00> : vector<16x128xf32>
    %16 = tpu.matmul %14, %15, %cst_11 {dimension_numbers = #tpu.dot_dimension_numbers<[1], [0], [0], [1], [0, 0, 1, 1], [], []>} : vector<16x128xf32>, vector<128x128xf32>, vector<16x128xf32> -> vector<16x128xf32>
    %17 = arith.addf %1, %16 : vector<16x128xf32>
    %c0_12 = arith.constant 0 : index
    %c128 = arith.constant 128 : index
    %18 = vector.load %arg2[%c0_12, %c128] : memref<128x256xf32, #tpu.memory_space<vmem>>, vector<128x128xf32>
    %cst_13 = arith.constant dense<0.000000e+00> : vector<16x128xf32>
    %19 = tpu.matmul %0, %18, %cst_13 {dimension_numbers = #tpu.dot_dimension_numbers<[1], [0], [0], [1], [0, 0, 1, 1], [], []>} : vector<16x128xf32>, vector<128x128xf32>, vector<16x128xf32> -> vector<16x128xf32>
    %c0_14 = arith.constant 0 : index
    %c128_15 = arith.constant 128 : index
    %20 = vector.load %arg3[%c0_14, %c128_15] : memref<1x256xf32, #tpu.memory_space<vmem>>, vector<1x128xf32>
    %21 = vector.broadcast %20 : vector<1x128xf32> to vector<16x128xf32>
    %22 = arith.addf %19, %21 : vector<16x128xf32>
    %cst_16 = arith.constant 5.000000e-01 : f32
    %23 = vector.broadcast %cst_16 : f32 to vector<16x128xf32>
    %24 = arith.mulf %23, %22 : vector<16x128xf32>
    %cst_17 = arith.constant 0.707106769 : f32
    %25 = vector.broadcast %cst_17 : f32 to vector<16x128xf32>
    %26 = arith.mulf %22, %25 : vector<16x128xf32>
    %27 = math.erf %26 : vector<16x128xf32>
    %cst_18 = arith.constant 1.000000e+00 : f32
    %28 = vector.broadcast %cst_18 : f32 to vector<16x128xf32>
    %29 = arith.addf %28, %27 : vector<16x128xf32>
    %30 = arith.mulf %24, %29 : vector<16x128xf32>
    %c128_19 = arith.constant 128 : index
    %c0_20 = arith.constant 0 : index
    %31 = vector.load %arg4[%c128_19, %c0_20] : memref<256x128xf32, #tpu.memory_space<vmem>>, vector<128x128xf32>
    %cst_21 = arith.constant dense<0.000000e+00> : vector<16x128xf32>
    %32 = tpu.matmul %30, %31, %cst_21 {dimension_numbers = #tpu.dot_dimension_numbers<[1], [0], [0], [1], [0, 0, 1, 1], [], []>} : vector<16x128xf32>, vector<128x128xf32>, vector<16x128xf32> -> vector<16x128xf32>
    %33 = arith.addf %17, %32 : vector<16x128xf32>
    %c0_22 = arith.constant 0 : index
    %c0_23 = arith.constant 0 : index
    %34 = vector.load %arg5[%c0_22, %c0_23] : memref<1x128xf32, #tpu.memory_space<vmem>>, vector<1x128xf32>
    %35 = vector.broadcast %34 : vector<1x128xf32> to vector<16x128xf32>
    %36 = arith.addf %33, %35 : vector<16x128xf32>
    %c0_24 = arith.constant 0 : index
    %c0_25 = arith.constant 0 : index
    %37 = vector.load %arg6[%c0_24, %c0_25] : memref<16x128xf32, #tpu.memory_space<vmem>>, vector<16x128xf32>
    tpu.vector_store %arg6[%c0_24, %c0_25], %36 {strides = array<i32>} : memref<16x128xf32, #tpu.memory_space<vmem>>, vector<16x128xf32>,
    return
  }
  func.func @transform_0(%arg0: i32) -> (i32, i32) {
    %c0_i32 = arith.constant 0 : i32
    %c0_i32_0 = arith.constant 0 : i32
    return %arg0, %c0_i32 : i32, i32
  }
  func.func @transform_1(%arg0: i32) -> (i32, i32) {
    %c0_i32 = arith.constant 0 : i32
    %c0_i32_0 = arith.constant 0 : i32
    %c0_i32_1 = arith.constant 0 : i32
    return %c0_i32, %c0_i32_0 : i32, i32
  }
  func.func @transform_2(%arg0: i32) -> (i32, i32) {
    %c0_i32 = arith.constant 0 : i32
    %c0_i32_0 = arith.constant 0 : i32
    %c0_i32_1 = arith.constant 0 : i32
    return %c0_i32, %c0_i32_0 : i32, i32
  }
  func.func @transform_3(%arg0: i32) -> (i32, i32) {
    %c0_i32 = arith.constant 0 : i32
    %c0_i32_0 = arith.constant 0 : i32
    %c0_i32_1 = arith.constant 0 : i32
    return %c0_i32, %c0_i32_0 : i32, i32
  }
  func.func @transform_4(%arg0: i32) -> (i32, i32) {
    %c0_i32 = arith.constant 0 : i32
    %c0_i32_0 = arith.constant 0 : i32
    %c0_i32_1 = arith.constant 0 : i32
    return %c0_i32, %c0_i32_0 : i32, i32
  }
  func.func @transform_5(%arg0: i32) -> (i32, i32) {
    %c0_i32 = arith.constant 0 : i32
    %c0_i32_0 = arith.constant 0 : i32
    return %arg0, %c0_i32 : i32, i32
  }
}

</mosaic_0001>

<bundles_post_ra>
// kernel: feed_forward.1
= control target key start
LH: loop header
LB: loop body
LE: loop exit
PB: predicated region body
PF: predicated region fallthrough
CT: control target
= control target key end

     0   :  { %10 = vsyncpa [#allocation3], 0  ;;  %s1203_s0 = inlined_call_operand.vmem [shape: f32[32,128], index: 0, kind: input, shape index: {}]   ;;  %s1204_s1 = inlined_call_operand.hbm [shape: f32[128,256], index: 1, kind: input, shape index: {}]   ;;  %s1205_s2 = inlined_call_operand.vmem [shape: f32[1,256], index: 2, kind: input, shape index: {}]   ;;  %s1206_s3 = inlined_call_operand.hbm [shape: f32[256,128], index: 3, kind: input, shape index: {}]   ;;  %s1207_s4 = inlined_call_operand.vmem [shape: f32[1,128], index: 4, kind: input, shape index: {}]   ;;  %s1208_s5 = inlined_call_operand.vmem [shape: f32[32,128], index: 5, kind: output, shape index: {}]  }
   0x1   :  { %11 = vsyncpa [#allocation5], 0  ;;  %s1122_s18 = smov 0  }
   0x2 LB: > { %s1086_s19 = smov [#allocation2]   ;;  %s747_s21 = sadd.s32 4294967295, %s1084_s18   ;;  %s1084_s18 = sphi %s1122_s18, %s17_s18  }
   0x3   : > { %s170_s20 = sshll.u32 %s1086_s19, 4  ;;  %p749_p0 = scmp.ge.s32.totalorder %s1084_s18, 1  ;;  %s171_s20 = int_to_ptr.vmem [resolvable:$true] %s170_s20 }
   0x4   : > { %p158_p1 = scmp.lt.s32.totalorder %s1084_s18, 3  ;;  %p1136_p3 = scmp.eq.s32.totalorder %s747_s21, 0 }
   0x5   : > { %s1087_s24 = smov [#allocation4]   ;;  %s1029_s27 = scalar_lea.vmem %s171_s20, 4096 }
   0x6   : > { %p1130_p2 = pnand %p749_p0, %p158_p1  ;;  %s186_s25 = sshll.u32 %s1087_s24, 4  ;;  %s187_s25 = int_to_ptr.vmem [resolvable:$true] %s186_s25 }
   0x7   : > { %p1030_p7 = scmp.ne.s32.totalorder %s171_s20, %s1029_s27  ;;  %p1037_p10 = scmp.lt.s32.totalorder %s171_s20, %s171_s20 }
   0x8   : > { %p985_p4 = pneg %p1130_p2  ;;  %p1038_p11 = scmp.lt.s32.totalorder %s1029_s27, %s1029_s27 }
   0xa   : > { %p1144_p5 = pnand %p1136_p3, %p985_p4  ;;  %p1039_p12 = por %p1038_p11, %p1037_p10 }
   0xc   : > { %p1020_p6 = pneg %p1144_p5 }
   0xe   : > { %p1032_p8 = pnand %p1030_p7, %p1020_p6 }
  0x10   : > { %p1033_p9 = pneg %p1032_p8 }
  0x12   : > { %p1040_p13 = pnand %p1039_p12, %p1033_p9 }
  0x14   : > { %1043 = shalt.err (!%p1040_p13)
}
  0x15   : > { %s1088_s28 = smov 256   ;;  %s1089_s29 = smov 16  }
  0x16   : > { %988 = dma.hbm_to_vmem [thread:$0]  (!%p1144_p5), %s1204_s1, 4096, %s171_s20, [#allocation3], %s1088_s28, %s1088_s28, %s1089_s29  }
  0x17   : > { %s1055_s7 = scalar_lea.vmem %s187_s25, 4096  ;;  %p1063_p7 = scmp.lt.s32.totalorder %s187_s25, %s187_s25 }
  0x18   : > { %p1056_p0 = scmp.ne.s32.totalorder %s187_s25, %s1055_s7  ;;  %p1064_p8 = scmp.lt.s32.totalorder %s1055_s7, %s1055_s7 }
  0x1a   : > { %p1058_p1 = pnand %p1056_p0, %p1020_p6  ;;  %p1065_p10 = por %p1064_p8, %p1063_p7 }
  0x1c   : > { %p1059_p4 = pneg %p1058_p1 }
  0x1e   : > { %p1066_p9 = pnand %p1065_p10, %p1059_p4 }
  0x20   : > { %1069 = shalt.err (!%p1066_p9)
}
  0x21   : > { %s1090_s8 = smov 128   ;;  %s1091_s9 = smov 8  }
  0x22   : > { %991 = dma.hbm_to_vmem [thread:$0]  (!%p1144_p5), %s1206_s3, 4096, %s187_s25, [#allocation5], %s1090_s8, %s1090_s8, %s1091_s9  }
  0x23   : > { %214 = sbr.rel (%p1130_p2) target bundleno = 496 (0x1f0), region = 40 }
  0x28   : > { %1075 = dma.done.wait (%p1136_p3), [#allocation3], 4096  }
  0x29   : > { %1077 = vsyncadd (%p1136_p3), [#allocation3], 4294963200 }
  0x2a   : > { %1079 = dma.done.wait (%p1136_p3), [#allocation5], 4096  }
  0x2b   : > { %1081 = vsyncadd (%p1136_p3), [#allocation5], 4294963200  ;;  %v275_v0 = vld [vmem:[#allocation2 + $0xf0] sm:$0xff]  ;;  %v399_v1 = vld [vmem:[#allocation2 + $0xf8] sm:$0xff]  ;;  %s756_s12 = sshll.u32 %s747_s21, 1 }
  0x2c   : > { %v274_v2 = vld [vmem:[#allocation2 + $0xe0] sm:$0xff]  ;;  %837 = vmatprep.subr.mxu0 %v275_v0  ;;  %872 = vmatprep.subr.mxu1 %v399_v1  ;;  %v398_v3 = vld [vmem:[#allocation2 + $0xe8] sm:$0xff]  ;;  %v273_v4 = vld [vmem:[#allocation2 + $0xd0] sm:$0xff]  ;;  %p247_p2 = scmp.lt.s32.totalorder %s756_s12, 3 }
  0x2d   : > { %838 = vmatpush3.msra.mxu0 %v275_v0  ;;  %873 = vmatpush3.msra.mxu1 %v399_v1  ;;  %v397_v5 = vld [vmem:[#allocation2 + $0xd8] sm:$0xff]  ;;  %v272_v6 = vld [vmem:[#allocation2 + $0xc0] sm:$0xff]  ;;  %v396_v7 = vld [vmem:[#allocation2 + $0xc8] sm:$0xff] }
  0x2e   : > { %839 = vmatprep.subr.mxu0 %v274_v2  ;;  %874 = vmatprep.subr.mxu1 %v398_v3  ;;  %v271_v8 = vld [vmem:[#allocation2 + $0xb0] sm:$0xff]  ;;  %v395_v9 = vld [vmem:[#allocation2 + $0xb8] sm:$0xff]  ;;  %v270_v10 = vld [vmem:[#allocation2 + $0xa0] sm:$0xff]  ;;  %s1213_s12 = smov (!%p247_p2, %s756_s12), 3 }
  0x2f   : > { %840 = vmatpush3.msra.mxu0 %v274_v2  ;;  %875 = vmatpush3.msra.mxu1 %v398_v3  ;;  %v394_v11 = vld [vmem:[#allocation2 + $0xa8] sm:$0xff]  ;;  %v269_v12 = vld [vmem:[#allocation2 + $0x90] sm:$0xff]  ;;  %v393_v13 = vld [vmem:[#allocation2 + $0x98] sm:$0xff]  ;;  %s757_s13 = sshll.u32 %s1213_s12, 3 }
  0x30   : > { %841 = vmatprep.subr.mxu0 %v273_v4  ;;  %876 = vmatprep.subr.mxu1 %v397_v5  ;;  %v268_v14 = vld [vmem:[#allocation2 + $0x80] sm:$0xff]  ;;  %v392_v15 = vld [vmem:[#allocation2 + $0x88] sm:$0xff]  ;;  %v267_v16 = vld [vmem:[#allocation2 + $0x70] sm:$0xff]  ;;  %s250_s16 = scalar_lea.vmem %s1203_s0, %s757_s13  ;;  %s256_s26 = scalar_lea.vmem %s1208_s5, %s757_s13 }
  0x31   : > { %842 = vmatpush3.msra.mxu0 %v273_v4  ;;  %877 = vmatpush3.msra.mxu1 %v397_v5  ;;  %v391_v17 = vld [vmem:[#allocation2 + $0x78] sm:$0xff]  ;;  %v266_v18 = vld [vmem:[#allocation2 + $0x60] sm:$0xff]  ;;  %v390_v19 = vld [vmem:[#allocation2 + $0x68] sm:$0xff] }
  0x32   : > { %843 = vmatprep.subr.mxu0 %v272_v6  ;;  %878 = vmatprep.subr.mxu1 %v396_v7  ;;  %v265_v20 = vld [vmem:[#allocation2 + $0x50] sm:$0xff]  ;;  %v389_v21 = vld [vmem:[#allocation2 + $0x58] sm:$0xff]  ;;  %v264_v22 = vld [vmem:[#allocation2 + $0x40] sm:$0xff] }
  0x33   : > { %844 = vmatpush3.msra.mxu0 %v272_v6  ;;  %879 = vmatpush3.msra.mxu1 %v396_v7  ;;  %v388_v23 = vld [vmem:[#allocation2 + $0x48] sm:$0xff]  ;;  %v263_v24 = vld [vmem:[#allocation2 + $0x30] sm:$0xff]  ;;  %v387_v25 = vld [vmem:[#allocation2 + $0x38] sm:$0xff] }
  0x34   : > { %845 = vmatprep.subr.mxu0 %v271_v8  ;;  %880 = vmatprep.subr.mxu1 %v395_v9  ;;  %v262_v26 = vld [vmem:[#allocation2 + $0x20] sm:$0xff]  ;;  %v386_v27 = vld [vmem:[#allocation2 + $0x28] sm:$0xff]  ;;  %v261_v28 = vld [vmem:[#allocation2 + $0x10] sm:$0xff] }
  0x35   : > { %846 = vmatpush3.msra.mxu0 %v271_v8  ;;  %881 = vmatpush3.msra.mxu1 %v395_v9  ;;  %v385_v29 = vld [vmem:[#allocation2 + $0x18] sm:$0xff]  ;;  %v260_v30 = vld [vmem:[#allocation2] sm:$0xff]  ;;  %v384_v31 = vld [vmem:[#allocation2 + $0x8] sm:$0xff] }
  0x36   : > { %847 = vmatprep.subr.mxu0 %v270_v10  ;;  %882 = vmatprep.subr.mxu1 %v394_v11  ;;  %v258_v32 = vld [vmem:[%s250_s16] sm:$0xff]  ;;  %v259_v33 = vld [vmem:[%s250_s16 + $0x8] sm:$0xff]  ;;  %v507_v34 = vld [vmem:[#allocation4 + $0xf8] sm:$0xff] }
  0x37   : > { %848 = vmatpush3.msra.mxu0 %v270_v10  ;;  %883 = vmatpush3.msra.mxu1 %v394_v11  ;;  %v383_v35 = vld [vmem:[#allocation4 + $0x78] sm:$0xff]  ;;  %v506_v36 = vld [vmem:[#allocation4 + $0xf0] sm:$0xff]  ;;  %v505_v38 = vld [vmem:[#allocation4 + $0xe8] sm:$0xff] }
  0x38   : > { %849 = vmatprep.subr.mxu0 %v269_v12  ;;  %884 = vmatprep.subr.mxu1 %v393_v13  ;;  %v382_v37 = vld [vmem:[#allocation4 + $0x70] sm:$0xff]  ;;  %v381_v39 = vld [vmem:[#allocation4 + $0x68] sm:$0xff]  ;;  %v504_v40 = vld [vmem:[#allocation4 + $0xe0] sm:$0xff] }
  0x39   : > { %850 = vmatpush3.msra.mxu0 %v269_v12  ;;  %885 = vmatpush3.msra.mxu1 %v393_v13  ;;  %v380_v41 = vld [vmem:[#allocation4 + $0x60] sm:$0xff]  ;;  %v503_v42 = vld [vmem:[#allocation4 + $0xd8] sm:$0xff]  ;;  %v502_v44 = vld [vmem:[#allocation4 + $0xd0] sm:$0xff] }
  0x3a   : > { %851 = vmatprep.subr.mxu0 %v268_v14  ;;  %886 = vmatprep.subr.mxu1 %v392_v15  ;;  %v379_v43 = vld [vmem:[#allocation4 + $0x58] sm:$0xff]  ;;  %v378_v45 = vld [vmem:[#allocation4 + $0x50] sm:$0xff]  ;;  %v501_v46 = vld [vmem:[#allocation4 + $0xc8] sm:$0xff] }
  0x3b   : > { %852 = vmatpush3.msra.mxu0 %v268_v14  ;;  %887 = vmatpush3.msra.mxu1 %v392_v15  ;;  %v377_v47 = vld [vmem:[#allocation4 + $0x48] sm:$0xff]  ;;  %v500_v48 = vld [vmem:[#allocation4 + $0xc0] sm:$0xff]  ;;  %v499_v50 = vld [vmem:[#allocation4 + $0xb8] sm:$0xff] }
  0x3c   : > { %853 = vmatprep.subr.mxu0 %v267_v16  ;;  %888 = vmatprep.subr.mxu1 %v391_v17  ;;  %v376_v49 = vld [vmem:[#allocation4 + $0x40] sm:$0xff]  ;;  %v375_v51 = vld [vmem:[#allocation4 + $0x38] sm:$0xff]  ;;  %v498_v52 = vld [vmem:[#allocation4 + $0xb0] sm:$0xff] }
  0x3d   : > { %854 = vmatpush3.msra.mxu0 %v267_v16  ;;  %889 = vmatpush3.msra.mxu1 %v391_v17  ;;  %v374_v53 = vld [vmem:[#allocation4 + $0x30] sm:$0xff]  ;;  %v497_v54 = vld [vmem:[#allocation4 + $0xa8] sm:$0xff]  ;;  %v496_v56 = vld [vmem:[#allocation4 + $0xa0] sm:$0xff] }
  0x3e   : > { %855 = vmatprep.subr.mxu0 %v266_v18  ;;  %890 = vmatprep.subr.mxu1 %v390_v19  ;;  %v373_v55 = vld [vmem:[#allocation4 + $0x28] sm:$0xff]  ;;  %v372_v57 = vld [vmem:[#allocation4 + $0x20] sm:$0xff]  ;;  %v495_v58 = vld [vmem:[#allocation4 + $0x98] sm:$0xff] }
  0x3f   : > { %856 = vmatpush3.msra.mxu0 %v266_v18  ;;  %891 = vmatpush3.msra.mxu1 %v390_v19  ;;  %v371_v59 = vld [vmem:[#allocation4 + $0x18] sm:$0xff]  ;;  %v494_v60 = vld [vmem:[#allocation4 + $0x90] sm:$0xff]  ;;  %v493_v62 = vld [vmem:[#allocation4 + $0x88] sm:$0xff] }
  0x40   : > { %857 = vmatprep.subr.mxu0 %v265_v20  ;;  %892 = vmatprep.subr.mxu1 %v389_v21  ;;  %v370_v61 = vld [vmem:[#allocation4 + $0x10] sm:$0xff]  ;;  %v369_v63 = vld [vmem:[#allocation4 + $0x8] sm:$0xff]  ;;  %v492_v0 = vld [vmem:[#allocation4 + $0x80] sm:$0xff] }
  0x41   : > { %858 = vmatpush3.msra.mxu0 %v265_v20  ;;  %893 = vmatpush3.msra.mxu1 %v389_v21  ;;  %v368_v1 = vld [vmem:[#allocation4] sm:$0xff] }
  0x42   : > { %859 = vmatprep.subr.mxu0 %v264_v22  ;;  %894 = vmatprep.subr.mxu1 %v388_v23  ;;  %v760_v2 = vld [vmem:[%s1205_s2] ss:$0 sm:$0xff]  ;;  %v761_v3 = vld [vmem:[%s1205_s2 + $0x1] ss:$0 sm:$0xff] }
  0x43   : > { %860 = vmatpush3.msra.mxu0 %v264_v22  ;;  %895 = vmatpush3.msra.mxu1 %v388_v23 }
  0x44   : > { %861 = vmatprep.subr.mxu0 %v263_v24  ;;  %896 = vmatprep.subr.mxu1 %v387_v25 }
  0x45   : > { %862 = vmatpush3.msra.mxu0 %v263_v24  ;;  %897 = vmatpush3.msra.mxu1 %v387_v25 }
  0x46   : > { %863 = vmatprep.subr.mxu0 %v262_v26  ;;  %898 = vmatprep.subr.mxu1 %v386_v27 }
  0x47   : > { %864 = vmatpush3.msra.mxu0 %v262_v26  ;;  %899 = vmatpush3.msra.mxu1 %v386_v27 }
  0x48   : > { %865 = vmatprep.subr.mxu0 %v261_v28  ;;  %900 = vmatprep.subr.mxu1 %v385_v29 }
  0x49   : > { %866 = vmatpush3.msra.mxu0 %v261_v28  ;;  %901 = vmatpush3.msra.mxu1 %v385_v29 }
  0x4a   : > { %867 = vmatprep.subr.mxu0 %v260_v30  ;;  %902 = vmatprep.subr.mxu1 %v384_v31 }
  0x4b   : > { %868 = vmatpush3.msra.mxu0 %v260_v30  ;;  %869 = vmatprep.mubr.f32.mxu0 %v258_v32 }
  0x4c   : > { %903 = vmatpush3.msra.mxu1 %v384_v31  ;;  %904 = vmatprep.mubr.f32.mxu1 %v258_v32 }
  0x4d   : > { %870 = vmatmul.mubr.f32.vlgmr.msra.gmra.mxu0 %v259_v33  ;;  %905 = vmatmul.mubr.f32.vlgmr.msra.gmra.mxu1 %v259_v33 }
  0x4e   : > { %907 = vmatprep.subr.mxu0 %v507_v34  ;;  %942 = vmatprep.subr.mxu1 %v383_v35 }
  0x4f   : > { %908 = vmatpush3.msra.mxu0 %v507_v34  ;;  %943 = vmatpush3.msra.mxu1 %v383_v35 }
  0x50   : > { %909 = vmatprep.subr.mxu0 %v506_v36  ;;  %944 = vmatprep.subr.mxu1 %v382_v37 }
  0x51   : > { %910 = vmatpush3.msra.mxu0 %v506_v36  ;;  %945 = vmatpush3.msra.mxu1 %v382_v37  ;;  %v762_v37 = vld [vmem:[%s1207_s4] ss:$0 sm:$0xff] }
  0x52   : > { %911 = vmatprep.subr.mxu0 %v505_v38  ;;  %946 = vmatprep.subr.mxu1 %v381_v39 }
  0x53   : > { %912 = vmatpush3.msra.mxu0 %v505_v38  ;;  %947 = vmatpush3.msra.mxu1 %v381_v39 }
  0x54   : > { %913 = vmatprep.subr.mxu0 %v504_v40  ;;  %948 = vmatprep.subr.mxu1 %v380_v41 }
  0x55   : > { %914 = vmatpush3.msra.mxu0 %v504_v40  ;;  %949 = vmatpush3.msra.mxu1 %v380_v41 }
  0x56   : > { %915 = vmatprep.subr.mxu0 %v503_v42  ;;  %950 = vmatprep.subr.mxu1 %v379_v43 }
  0x57   : > { %916 = vmatpush3.msra.mxu0 %v503_v42  ;;  %951 = vmatpush3.msra.mxu1 %v379_v43 }
  0x58   : > { %917 = vmatprep.subr.mxu0 %v502_v44  ;;  %952 = vmatprep.subr.mxu1 %v378_v45 }
  0x59   : > { %918 = vmatpush3.msra.mxu0 %v502_v44  ;;  %953 = vmatpush3.msra.mxu1 %v378_v45 }
  0x5a   : > { %919 = vmatprep.subr.mxu0 %v501_v46  ;;  %954 = vmatprep.subr.mxu1 %v377_v47 }
  0x5b   : > { %920 = vmatpush3.msra.mxu0 %v501_v46  ;;  %955 = vmatpush3.msra.mxu1 %v377_v47 }
  0x5c   : > { %921 = vmatprep.subr.mxu0 %v500_v48  ;;  %956 = vmatprep.subr.mxu1 %v376_v49 }
  0x5d   : > { %922 = vmatpush3.msra.mxu0 %v500_v48  ;;  %957 = vmatpush3.msra.mxu1 %v376_v49 }
  0x5e   : > { %923 = vmatprep.subr.mxu0 %v499_v50  ;;  %958 = vmatprep.subr.mxu1 %v375_v51 }
  0x5f   : > { %924 = vmatpush3.msra.mxu0 %v499_v50  ;;  %959 = vmatpush3.msra.mxu1 %v375_v51 }
  0x60   : > { %925 = vmatprep.subr.mxu0 %v498_v52  ;;  %960 = vmatprep.subr.mxu1 %v374_v53 }
  0x61   : > { %926 = vmatpush3.msra.mxu0 %v498_v52  ;;  %961 = vmatpush3.msra.mxu1 %v374_v53 }
  0x62   : > { %927 = vmatprep.subr.mxu0 %v497_v54  ;;  %962 = vmatprep.subr.mxu1 %v373_v55 }
  0x63   : > { %928 = vmatpush3.msra.mxu0 %v497_v54  ;;  %963 = vmatpush3.msra.mxu1 %v373_v55 }
  0x64   : > { %929 = vmatprep.subr.mxu0 %v496_v56  ;;  %964 = vmatprep.subr.mxu1 %v372_v57 }
  0x65   : > { %930 = vmatpush3.msra.mxu0 %v496_v56  ;;  %965 = vmatpush3.msra.mxu1 %v372_v57 }
  0x66   : > { %931 = vmatprep.subr.mxu0 %v495_v58  ;;  %966 = vmatprep.subr.mxu1 %v371_v59 }
  0x67   : > { %932 = vmatpush3.msra.mxu0 %v495_v58  ;;  %967 = vmatpush3.msra.mxu1 %v371_v59 }
  0x68   : > { %933 = vmatprep.subr.mxu0 %v494_v60  ;;  %968 = vmatprep.subr.mxu1 %v370_v61 }
  0x69   : > { %934 = vmatpush3.msra.mxu0 %v494_v60  ;;  %969 = vmatpush3.msra.mxu1 %v370_v61 }
  0x6a   : > { %935 = vmatprep.subr.mxu0 %v493_v62  ;;  %970 = vmatprep.subr.mxu1 %v369_v63 }
  0x6b   : > { %936 = vmatpush3.msra.mxu0 %v493_v62  ;;  %971 = vmatpush3.msra.mxu1 %v369_v63 }
  0x6c   : > { %937 = vmatprep.subr.mxu0 %v492_v0  ;;  %972 = vmatprep.subr.mxu1 %v368_v1 }
  0x6d   : > { %938 = vmatpush3.msra.mxu0 %v492_v0  ;;  %973 = vmatpush3.msra.mxu1 %v368_v1 }
 0x10d   : > { %v871_v4 = vpop.f32.mrf.mxu0  ;;  %v906_v5 = vpop.f32.mrf.mxu1 }
 0x10e   : > { %v355_v6 = vadd.f32 %v871_v4, %v760_v2  ;;  %v479_v7 = vadd.f32 %v906_v5, %v761_v3 }
 0x10f   : > { %v349_v8 = vpop.f32.mrf.mxu0  ;;  %v473_v9 = vpop.f32.mrf.mxu1 }
 0x110   : > { %v361_v10 = vmul.f32 0.70710677, %v355_v6  ;;  %v485_v11 = vmul.f32 0.70710677, %v479_v7  ;;  %v350_v12 = vadd.f32 %v760_v2, %v349_v8  ;;  %v474_v13 = vadd.f32 %v761_v3, %v473_v9 }
 0x111   : > { %v359_v24 = vmul.f32 0.5, %v355_v6  ;;  %v483_v27 = vmul.f32 0.5, %v479_v7 }
 0x112   : > { %1010 = verf.f32 %v361_v10  ;;  %v360_v14 = vmul.f32 0.70710677, %v350_v12  ;;  %v484_v15 = vmul.f32 0.70710677, %v474_v13  ;;  %v358_v22 = vmul.f32 0.5, %v350_v12 }
 0x113   : > { %1012 = verf.f32 %v485_v11  ;;  %v482_v25 = vmul.f32 0.5, %v474_v13 }
 0x114   : > { %1014 = verf.f32 %v360_v14 }
 0x115   : > { %1016 = verf.f32 %v484_v15 }
 0x11f   : > { %v1011_v16 = vpop.eup %1010 }
 0x120   : > { %v1013_v17 = vpop.eup %1012  ;;  %v365_v19 = vadd.f32 1.0, %v1011_v16 }
 0x121   : > { %v1015_v18 = vpop.eup %1014  ;;  %v489_v21 = vadd.f32 1.0, %v1013_v17 }
 0x122   : > { %v1017_v20 = vpop.eup %1016  ;;  %v364_v23 = vadd.f32 1.0, %v1015_v18  ;;  %v367_v29 = vmul.f32 %v365_v19, %v359_v24 }
 0x123   : > { %v488_v26 = vadd.f32 1.0, %v1017_v20  ;;  %v491_v31 = vmul.f32 %v489_v21, %v483_v27 }
 0x124   : > { %v366_v28 = vmul.f32 %v364_v23, %v358_v22 }
 0x125   : > { %v490_v30 = vmul.f32 %v488_v26, %v482_v25 }
 0x126   : > { %974 = vmatprep.mubr.f32.mxu1 %v366_v28 }
 0x127   : > { %939 = vmatprep.mubr.f32.mxu0 %v490_v30  ;;  %975 = vmatmul.mubr.f32.vlgmr.msra.gmra.mxu1 %v367_v29 }
 0x128   : > { %940 = vmatmul.mubr.f32.vlgmr.msra.gmra.mxu0 %v491_v31 }
 0x1e7   : > { %v976_v32 = vpop.f32.mrf.mxu1 }
 0x1e8   : > { %v941_v33 = vpop.f32.mrf.mxu0 }
 0x1e9   : > { %v649_v34 = vpop.f32.mrf.mxu1  ;;  %v655_v35 = vadd.f32 %v976_v32, %v941_v33 }
 0x1ea   : > { %v574_v36 = vpop.f32.mrf.mxu0 }
 0x1eb   : > { %v650_v38 = vadd.f32 %v649_v34, %v574_v36  ;;  %v666_v40 = vadd.f32 %v762_v37, %v655_v35 }
 0x1ed   : > { %v665_v39 = vadd.f32 %v762_v37, %v650_v38  ;;  %668 = vst [vmem:[%s256_s26 + $0x8] sm:$0xff] %v666_v40 }
 0x1ef   : > { %667 = vst [vmem:[%s256_s26] sm:$0xff] %v665_v39 }
 0x1f0 PF: > { %s17_s18 = sadd.s32 1, %s1084_s18  }
 0x1f1   : > { %p14_p3 = scmp.ge.s32.totalorder %s17_s18, 4  }
 0x1f3   :  { %16 = sbr.rel (!%p14_p3) target bundleno = 2 (0x2), region = 79 }
 0x1f8   :  { %691 = vsyncpa [#allocation3], 1 }
 0x1f9   :  { %693 = vsyncpa [#allocation3 + $0x1], 1 }
 0x1fa   :  { %694 = vsyncpa [#allocation5], 1 }

</bundles_post_ra>
